<compile_context>
chip_gen: v6e
topology: v6e:2x2x1
jax: 0.10.0
libtpu: 0.0.40
codegen_flags: <defaults>
</compile_context>

<pallas_src>
import jax
import jax.numpy as jnp
from jax import lax
from jax.experimental import pallas as pl
from jax.experimental.pallas import tpu as pltpu

HIDDEN = 256   # GNN1 hidden_size
LSTM_H = 32


def _round_up(x, m):
    return ((x + m - 1) // m) * m


def _tanh_in_bf16_default():
    """v5e/v5p EUP has no bf16 path -> keep tanh in f32 there; bf16 on v6e/v7x."""
    try:
        kind = jax.devices()[0].device_kind.lower()
    except Exception:
        return True
    return "v5" not in kind


def _choose_tile(n, tile_m_max):
    """Node-tile size: multiple of 128, <= tile_m_max, and for n > 128 an even
    number of (near-)equal tiles so the 'parallel' grid axis balances across
    v7x's two TensorCores."""
    if n <= 128:
        return 128
    pairs = pl.cdiv(n, 2 * tile_m_max)
    return _round_up(pl.cdiv(n, 2 * pairs), 128)


# ----------------------------- Pallas kernel (hot path) -----------------------------

def _make_fused_mlp_kernel(tanh_in_bf16):
    f32, bf16 = jnp.float32, jnp.bfloat16
    act_dt = bf16 if tanh_in_bf16 else f32

    def kernel(a_ref,
               w1_ref, b1_ref,
               we1_ref, be1_ref, we2_ref, be2_ref,
               wd1_ref, bd1_ref, wd2_ref, bd2_ref,
               wo_ref, bo_ref,
               out_ref):
        """Fused: L1 network (Linear(k,256)+Tanh) -> encoder -> decoder -> output head."""

        def dense_tanh(x, w_ref, b_ref):
            acc = jnp.dot(x, w_ref[...], preferred_element_type=f32) + b_ref[...]
            # bf16 tanh on v6e/v7x: halves the binding EUP work and removes the
            # separate f32->bf16 cast before the next matmul; f32 on v5e.
            return jnp.tanh(acc.astype(act_dt)).astype(bf16)

        a = a_ref[...]                                  # (tile, k) bf16
        # GNN1.aggregate: network(edge_attr.reshape(-1, k)) = tanh(Linear(k, 256))
        h = dense_tanh(a, w1_ref, b1_ref)               # (tile, 256)
        # encoder: Linear(256,128)+Tanh, Linear(128,6)+Tanh
        e = dense_tanh(h, we1_ref, be1_ref)             # (tile, 128)
        e = dense_tanh(e, we2_ref, be2_ref)             # (tile, 6)
        # decoder: Linear(6,128)+Tanh, Linear(128,256)
        d = dense_tanh(e, wd1_ref, bd1_ref)             # (tile, 128)
        d = jnp.dot(d, wd2_ref[...], preferred_element_type=f32) + bd2_ref[...]   # (tile, 256) f32
        # output head: Tanh, Linear(256,1), Sigmoid
        t = jnp.tanh(d.astype(act_dt)).astype(bf16)     # (tile, 256)
        # (1,256) @ (tile,256)^T  ->  lane-dense (1, tile) logits (nodes on lanes),
        # avoiding a (256,1)-shaped weight and masked 1-lane output stores.
        # TODO(synk): confirm in the Mosaic dump that this NT contraction does not
        # put a per-tile vxpose on the XLU critical path on v5e.
        logit = lax.dot_general(wo_ref[...], t,
                                dimension_numbers=(((1,), (1,)), ((), ())),
                                preferred_element_type=f32)      # (1, tile)
        out_ref[...] = jax.nn.sigmoid(logit + bo_ref[...])

    return kernel


def fused_mlp(a, p, tile_m=1024, tanh_in_bf16=None):
    """a: [N, k] (edge_attr reshaped per node).  Returns [N] (sigmoid prob per node)."""
    n, kdim = a.shape
    if tanh_in_bf16 is None:
        tanh_in_bf16 = _tanh_in_bf16_default()

    tile = _choose_tile(n, max(128, _round_up(int(tile_m), 128)))
    grid = pl.cdiv(n, tile)
    n_pad = grid * tile

    bf16 = jnp.bfloat16
    a_bf = a.astype(bf16)
    if n < tile:
        # Tiny inputs: zero-pad the single block (cheap, keeps it fully defined).
        a_bf = jnp.pad(a_bf, ((0, tile - n), (0, 0)))
    # Larger inputs: the trailing tile is a partial block.  Every op is row-wise,
    # so undefined padded rows never contaminate valid rows; they are sliced off.

    wo_row = p["wo"].T.astype(bf16)                      # (1, 256) head as a row vector
    weights = (p["w1"].astype(bf16), p["b1"],
               p["we1"].astype(bf16), p["be1"],
               p["we2"].astype(bf16), p["be2"],
               p["wd1"].astype(bf16), p["bd1"],
               p["wd2"].astype(bf16), p["bd2"],
               wo_row, p["bo"])

    def resident(arr):  # whole-array block, constant index map: stays resident in VMEM
        return pl.BlockSpec(arr.shape, lambda i: (0, 0))

    flops_per_row = 2 * (kdim * 256 + 256 * 128 + 128 * 6 + 6 * 128 + 128 * 256 + 256)
    # Lane-padded transcendental count: the (tile,6) tanh runs over full 128-lane vregs.
    trans_per_row = 256 + 128 + 128 + 128 + 256 + 1
    bytes_accessed = (int(a_bf.size) * 2
                      + sum(int(w.size) * w.dtype.itemsize for w in weights)
                      + n_pad * 4)

    out = pl.pallas_call(
        _make_fused_mlp_kernel(tanh_in_bf16),
        out_shape=jax.ShapeDtypeStruct((1, n_pad), jnp.float32),
        grid_spec=pltpu.PrefetchScalarGridSpec(
            num_scalar_prefetch=0,
            grid=(grid,),
            in_specs=[pl.BlockSpec((tile, kdim), lambda i: (i, 0))]
                     + [resident(w) for w in weights],
            out_specs=pl.BlockSpec((1, tile), lambda i: (0, i)),
        ),
        compiler_params=pltpu.CompilerParams(dimension_semantics=("parallel",)),
        cost_estimate=pl.CostEstimate(
            flops=int(flops_per_row) * int(n_pad),
            transcendentals=int(trans_per_row) * int(n_pad),
            bytes_accessed=int(bytes_accessed)),
    )(a_bf, *weights)

    # torch.squeeze(decoder, 1) -> [N]; nodes live on lanes, padded lanes sliced off.
    return out[0, :n]


def fused_mlp_ref(a, p):
    """Pure-f32 reference of the live path, for tolerance checking."""
    h = jnp.tanh(a @ p["w1"] + p["b1"])
    e = jnp.tanh(h @ p["we1"] + p["be1"])
    e = jnp.tanh(e @ p["we2"] + p["be2"])
    d = jnp.tanh(e @ p["wd1"] + p["bd1"])
    d = d @ p["wd2"] + p["bd2"]
    return jax.nn.sigmoid(jnp.tanh(d) @ p["wo"] + p["bo"])[:, 0]


# ------------------ dead-value paths (plain JAX, optional, for graph fidelity) ------------------
# These computations exist in the PyTorch graph but their values never reach the module
# output, so they are skipped by default (compute_dead_paths=False).

def lstm_forward(x, lp):
    """nn.LSTM(input_size=3, hidden_size=32, num_layers=1), input (seq=N, batch=1, 3)."""
    w_ih, w_hh, b_ih, b_hh = lp["w_ih"], lp["w_hh"], lp["b_ih"], lp["b_hh"]

    def step(carry, xt):
        h, c = carry
        gates = xt @ w_ih.T + b_ih + h @ w_hh.T + b_hh
        i, f, g, o = jnp.split(gates, 4)
        i, f, o = jax.nn.sigmoid(i), jax.nn.sigmoid(f), jax.nn.sigmoid(o)
        g = jnp.tanh(g)
        c = f * c + i * g
        h = o * jnp.tanh(c)
        return (h, c), h

    (_, _), hs = lax.scan(step, (jnp.zeros(LSTM_H), jnp.zeros(LSTM_H)), x)
    return hs  # [N, 32]


def gcn_conv(x, edge_index, weight, bias):
    """GCNConv(256,128): add self-loops, symmetric norm, sum aggregate, + bias."""
    n = x.shape[0]
    loop = jnp.arange(n)
    src = jnp.concatenate([edge_index[0], loop])
    dst = jnp.concatenate([edge_index[1], loop])
    ew = jnp.ones(src.shape[0], jnp.float32)
    deg = jnp.zeros((n,), jnp.float32).at[dst].add(ew)
    dinv = jnp.where(deg > 0, lax.rsqrt(deg), 0.0)
    norm = dinv[src] * dinv[dst]
    xw = x @ weight                                   # [N, 128]
    out = jnp.zeros((n, xw.shape[1]), jnp.float32).at[dst].add(norm[:, None] * xw[src])
    return out + bias


# ----------------------------------- full forward -----------------------------------

def gnn_forward(params, x, edge_index, edge_attr, k, compute_dead_paths=False):
    a = edge_attr.reshape(-1, k).astype(jnp.float32)   # GNN1.aggregate input_aggr

    # Live path (the only computation that reaches the PyTorch return value):
    out = fused_mlp(a, params)                         # [N]

    aux = None
    if compute_dead_paths:
        # TODO(synk): dead-value branch (LSTM + first L1 + GCN4) whose results are
        # discarded by the PyTorch forward; serial scan / scatter-add stay in plain JAX.
        lstm_out = lstm_forward(x, params["lstm"])                      # [N, 32]
        l1_first = jnp.tanh(a @ params["w1"] + params["b1"])            # first L1 call, [N, 256]
        gcn_out = gcn_conv(l1_first, edge_index, params["gcn4_w"], params["gcn4_b"])  # [N, 128]
        aux = (lstm_out, gcn_out)
    return out, aux


# ----------------------------------- params -----------------------------------

def init_params(key, k):
    def linear(kk, fan_in, fan_out):
        k1, k2 = jax.random.split(kk)
        bound = 1.0 / jnp.sqrt(jnp.float32(fan_in))
        w = jax.random.uniform(k1, (fan_in, fan_out), jnp.float32, -bound, bound)
        b = jax.random.uniform(k2, (1, fan_out), jnp.float32, -bound, bound)
        return w, b

    keys = jax.random.split(key, 12)
    p = {}
    p["w1"], p["b1"] = linear(keys[0], k, HIDDEN)        # GNN1.network: Linear(k,256)
    p["we1"], p["be1"] = linear(keys[1], HIDDEN, 128)    # encoder[0]
    p["we2"], p["be2"] = linear(keys[2], 128, 6)         # encoder[2]
    p["wd1"], p["bd1"] = linear(keys[3], 6, 128)         # decoder[0]
    p["wd2"], p["bd2"] = linear(keys[4], 128, 256)       # decoder[2]
    p["wo"], p["bo"] = linear(keys[5], 256, 1)           # output[1]
    wg, bg = linear(keys[6], HIDDEN, 128)                # GCN4: GCNConv(256,128)
    p["gcn4_w"], p["gcn4_b"] = wg, bg[0]
    lb = 1.0 / jnp.sqrt(jnp.float32(LSTM_H))
    lk = jax.random.split(keys[7], 4)
    p["lstm"] = dict(
        w_ih=jax.random.uniform(lk[0], (4 * LSTM_H, 3), jnp.float32, -lb, lb),
        w_hh=jax.random.uniform(lk[1], (4 * LSTM_H, LSTM_H), jnp.float32, -lb, lb),
        b_ih=jax.random.uniform(lk[2], (4 * LSTM_H,), jnp.float32, -lb, lb),
        b_hh=jax.random.uniform(lk[3], (4 * LSTM_H,), jnp.float32, -lb, lb),
    )
    # TODO(synk): GCN1 = GCNConv(3, 1) is declared in __init__ but never used in forward; omitted.
    return p


if __name__ == "__main__":
    key = jax.random.PRNGKey(0)
    kp, kx, ke, kei, ke2 = jax.random.split(key, 5)

    N, K = 32, 8                                  # N nodes, k nearest neighbours
    params = init_params(kp, K)

    x = jax.random.normal(kx, (N, 3), jnp.float32)                 # node features (LSTM input_size=3)
    edge_attr = jax.random.uniform(ke, (N * K, 1), jnp.float32)    # kNN distances, k edges per node
    # kNN-style edge_index: node i's k edges are contiguous (required by reshape(-1, k))
    dst = jnp.repeat(jnp.arange(N), K)
    src = (dst + 1 + jax.random.randint(kei, (N * K,), 0, N - 1)) % N
    edge_index = jnp.stack([src, dst]).astype(jnp.int32)           # [2, N*K]

    out, aux = gnn_forward(params, x, edge_index, edge_attr, K)
    jax.block_until_ready(out)
    assert out.shape == (N,)
    assert bool(jnp.all(jnp.isfinite(out)))
    assert bool(jnp.all((out >= 0.0) & (out <= 1.0)))   # sigmoid output
    ref = fused_mlp_ref(edge_attr.reshape(-1, K), params)
    assert bool(jnp.max(jnp.abs(out - ref)) < 8e-2)     # bf16 weights/activations tolerance

    # Second, slightly larger case: exercises the multi-tile (even grid) path with a
    # partial trailing node block and no host-side pad.
    N2 = 300
    edge_attr2 = jax.random.uniform(ke2, (N2 * K, 1), jnp.float32)
    dst2 = jnp.repeat(jnp.arange(N2), K)
    src2 = (dst2 + 1) % N2
    edge_index2 = jnp.stack([src2, dst2]).astype(jnp.int32)
    x2 = jnp.zeros((N2, 3), jnp.float32)
    out2, _ = gnn_forward(params, x2, edge_index2, edge_attr2, K)
    jax.block_until_ready(out2)
    assert out2.shape == (N2,)
    ref2 = fused_mlp_ref(edge_attr2.reshape(-1, K), params)
    assert bool(jnp.all(jnp.isfinite(out2)))
    assert bool(jnp.max(jnp.abs(out2 - ref2)) < 8e-2)

    print("KERNEL_OK")
</pallas_src>

<mosaic_0001>
module attributes {stable_mosaic.version = 11 : i64} {
  func.func @kernel(%arg0: i32, %arg1: memref<128x8xbf16, #tpu.memory_space<vmem>>, %arg2: memref<8x256xbf16, #tpu.memory_space<vmem>>, %arg3: memref<1x256xf32, #tpu.memory_space<vmem>>, %arg4: memref<256x128xbf16, #tpu.memory_space<vmem>>, %arg5: memref<1x128xf32, #tpu.memory_space<vmem>>, %arg6: memref<128x6xbf16, #tpu.memory_space<vmem>>, %arg7: memref<1x6xf32, #tpu.memory_space<vmem>>, %arg8: memref<6x128xbf16, #tpu.memory_space<vmem>>, %arg9: memref<1x128xf32, #tpu.memory_space<vmem>>, %arg10: memref<128x256xbf16, #tpu.memory_space<vmem>>, %arg11: memref<1x256xf32, #tpu.memory_space<vmem>>, %arg12: memref<1x256xbf16, #tpu.memory_space<vmem>>, %arg13: memref<1x1xf32, #tpu.memory_space<vmem>>, %arg14: memref<1x128xf32, #tpu.memory_space<vmem>>) attributes {dimension_semantics = [#tpu.dimension_semantics<parallel>], iteration_bounds = array<i64: 1>, scalar_prefetch = 0 : i64, scratch_operands = 0 : i64, tpu.core_type = #tpu.core_type<tc>, window_params = [{transform_indices = @transform_0, window_bounds = array<i64: 128, 8>}, {pipeline_mode = #tpu.pipeline_mode<synchronous>, transform_indices = @transform_1, window_bounds = array<i64: 8, 256>}, {pipeline_mode = #tpu.pipeline_mode<synchronous>, transform_indices = @transform_2, window_bounds = array<i64: 1, 256>}, {pipeline_mode = #tpu.pipeline_mode<synchronous>, transform_indices = @transform_3, window_bounds = array<i64: 256, 128>}, {pipeline_mode = #tpu.pipeline_mode<synchronous>, transform_indices = @transform_4, window_bounds = array<i64: 1, 128>}, {pipeline_mode = #tpu.pipeline_mode<synchronous>, transform_indices = @transform_5, window_bounds = array<i64: 128, 6>}, {pipeline_mode = #tpu.pipeline_mode<synchronous>, transform_indices = @transform_6, window_bounds = array<i64: 1, 6>}, {pipeline_mode = #tpu.pipeline_mode<synchronous>, transform_indices = @transform_7, window_bounds = array<i64: 6, 128>}, {pipeline_mode = #tpu.pipeline_mode<synchronous>, transform_indices = @transform_8, window_bounds = array<i64: 1, 128>}, {pipeline_mode = #tpu.pipeline_mode<synchronous>, transform_indices = @transform_9, window_bounds = array<i64: 128, 256>}, {pipeline_mode = #tpu.pipeline_mode<synchronous>, transform_indices = @transform_10, window_bounds = array<i64: 1, 256>}, {pipeline_mode = #tpu.pipeline_mode<synchronous>, transform_indices = @transform_11, window_bounds = array<i64: 1, 256>}, {pipeline_mode = #tpu.pipeline_mode<synchronous>, transform_indices = @transform_12, window_bounds = array<i64: 1, 1>}, {transform_indices = @transform_13, window_bounds = array<i64: 1, 128>}]} {
    %c0 = arith.constant 0 : index
    %c0_0 = arith.constant 0 : index
    %0 = vector.load %arg1[%c0, %c0_0] : memref<128x8xbf16, #tpu.memory_space<vmem>>, vector<128x8xbf16>
    %c0_1 = arith.constant 0 : index
    %c0_2 = arith.constant 0 : index
    %1 = vector.load %arg2[%c0_1, %c0_2] : memref<8x256xbf16, #tpu.memory_space<vmem>>, vector<8x256xbf16>
    %cst = arith.constant dense<0.000000e+00> : vector<128x256xf32>
    %2 = tpu.matmul %0, %1, %cst {dimension_numbers = #tpu.dot_dimension_numbers<[1], [0], [0], [1], [0, 0, 1, 1], [], []>} : vector<128x8xbf16>, vector<8x256xbf16>, vector<128x256xf32> -> vector<128x256xf32>
    %c0_3 = arith.constant 0 : index
    %c0_4 = arith.constant 0 : index
    %3 = vector.load %arg3[%c0_3, %c0_4] : memref<1x256xf32, #tpu.memory_space<vmem>>, vector<1x256xf32>
    %4 = vector.broadcast %3 : vector<1x256xf32> to vector<128x256xf32>
    %5 = arith.addf %2, %4 : vector<128x256xf32>
    %6 = arith.truncf %5 : vector<128x256xf32> to vector<128x256xbf16>
    %7 = math.tanh %6 : vector<128x256xbf16>
    %c0_5 = arith.constant 0 : index
    %c0_6 = arith.constant 0 : index
    %8 = vector.load %arg4[%c0_5, %c0_6] : memref<256x128xbf16, #tpu.memory_space<vmem>>, vector<256x128xbf16>
    %cst_7 = arith.constant dense<0.000000e+00> : vector<128x128xf32>
    %9 = tpu.matmul %7, %8, %cst_7 {dimension_numbers = #tpu.dot_dimension_numbers<[1], [0], [0], [1], [0, 0, 1, 1], [], []>} : vector<128x256xbf16>, vector<256x128xbf16>, vector<128x128xf32> -> vector<128x128xf32>
    %c0_8 = arith.constant 0 : index
    %c0_9 = arith.constant 0 : index
    %10 = vector.load %arg5[%c0_8, %c0_9] : memref<1x128xf32, #tpu.memory_space<vmem>>, vector<1x128xf32>
    %11 = vector.broadcast %10 : vector<1x128xf32> to vector<128x128xf32>
    %12 = arith.addf %9, %11 : vector<128x128xf32>
    %13 = arith.truncf %12 : vector<128x128xf32> to vector<128x128xbf16>
    %14 = math.tanh %13 : vector<128x128xbf16>
    %c0_10 = arith.constant 0 : index
    %c0_11 = arith.constant 0 : index
    %15 = vector.load %arg6[%c0_10, %c0_11] : memref<128x6xbf16, #tpu.memory_space<vmem>>, vector<128x6xbf16>
    %cst_12 = arith.constant dense<0.000000e+00> : vector<128x6xf32>
    %16 = tpu.matmul %14, %15, %cst_12 {dimension_numbers = #tpu.dot_dimension_numbers<[1], [0], [0], [1], [0, 0, 1, 1], [], []>} : vector<128x128xbf16>, vector<128x6xbf16>, vector<128x6xf32> -> vector<128x6xf32>
    %c0_13 = arith.constant 0 : index
    %c0_14 = arith.constant 0 : index
    %17 = vector.load %arg7[%c0_13, %c0_14] : memref<1x6xf32, #tpu.memory_space<vmem>>, vector<1x6xf32>
    %18 = vector.broadcast %17 : vector<1x6xf32> to vector<128x6xf32>
    %19 = arith.addf %16, %18 : vector<128x6xf32>
    %20 = arith.truncf %19 : vector<128x6xf32> to vector<128x6xbf16>
    %21 = math.tanh %20 : vector<128x6xbf16>
    %c0_15 = arith.constant 0 : index
    %c0_16 = arith.constant 0 : index
    %22 = vector.load %arg8[%c0_15, %c0_16] : memref<6x128xbf16, #tpu.memory_space<vmem>>, vector<6x128xbf16>
    %cst_17 = arith.constant dense<0.000000e+00> : vector<128x128xf32>
    %23 = tpu.matmul %21, %22, %cst_17 {dimension_numbers = #tpu.dot_dimension_numbers<[1], [0], [0], [1], [0, 0, 1, 1], [], []>} : vector<128x6xbf16>, vector<6x128xbf16>, vector<128x128xf32> -> vector<128x128xf32>
    %c0_18 = arith.constant 0 : index
    %c0_19 = arith.constant 0 : index
    %24 = vector.load %arg9[%c0_18, %c0_19] : memref<1x128xf32, #tpu.memory_space<vmem>>, vector<1x128xf32>
    %25 = vector.broadcast %24 : vector<1x128xf32> to vector<128x128xf32>
    %26 = arith.addf %23, %25 : vector<128x128xf32>
    %27 = arith.truncf %26 : vector<128x128xf32> to vector<128x128xbf16>
    %28 = math.tanh %27 : vector<128x128xbf16>
    %c0_20 = arith.constant 0 : index
    %c0_21 = arith.constant 0 : index
    %29 = vector.load %arg10[%c0_20, %c0_21] : memref<128x256xbf16, #tpu.memory_space<vmem>>, vector<128x256xbf16>
    %cst_22 = arith.constant dense<0.000000e+00> : vector<128x256xf32>
    %30 = tpu.matmul %28, %29, %cst_22 {dimension_numbers = #tpu.dot_dimension_numbers<[1], [0], [0], [1], [0, 0, 1, 1], [], []>} : vector<128x128xbf16>, vector<128x256xbf16>, vector<128x256xf32> -> vector<128x256xf32>
    %c0_23 = arith.constant 0 : index
    %c0_24 = arith.constant 0 : index
    %31 = vector.load %arg11[%c0_23, %c0_24] : memref<1x256xf32, #tpu.memory_space<vmem>>, vector<1x256xf32>
    %32 = vector.broadcast %31 : vector<1x256xf32> to vector<128x256xf32>
    %33 = arith.addf %30, %32 : vector<128x256xf32>
    %34 = arith.truncf %33 : vector<128x256xf32> to vector<128x256xbf16>
    %35 = math.tanh %34 : vector<128x256xbf16>
    %c0_25 = arith.constant 0 : index
    %c0_26 = arith.constant 0 : index
    %36 = vector.load %arg12[%c0_25, %c0_26] : memref<1x256xbf16, #tpu.memory_space<vmem>>, vector<1x256xbf16>
    %cst_27 = arith.constant dense<0.000000e+00> : vector<1x128xf32>
    %37 = tpu.matmul %36, %35, %cst_27 {dimension_numbers = #tpu.dot_dimension_numbers<[1], [1], [0], [0], [0, 0, 1, 0], [], []>} : vector<1x256xbf16>, vector<128x256xbf16>, vector<1x128xf32> -> vector<1x128xf32>
    %c0_28 = arith.constant 0 : index
    %c0_29 = arith.constant 0 : index
    %38 = vector.load %arg13[%c0_28, %c0_29] : memref<1x1xf32, #tpu.memory_space<vmem>>, vector<1x1xf32>
    %39 = vector.broadcast %38 : vector<1x1xf32> to vector<1x128xf32>
    %40 = arith.addf %37, %39 : vector<1x128xf32>
    %41 = arith.negf %40 : vector<1x128xf32>
    %42 = math.exp %41 : vector<1x128xf32>
    %cst_30 = arith.constant 1.000000e+00 : f32
    %43 = vector.broadcast %cst_30 : f32 to vector<1x128xf32>
    %44 = arith.addf %43, %42 : vector<1x128xf32>
    %45 = arith.divf %43, %44 : vector<1x128xf32>
    %c0_31 = arith.constant 0 : index
    %c0_32 = arith.constant 0 : index
    %46 = vector.load %arg14[%c0_31, %c0_32] : memref<1x128xf32, #tpu.memory_space<vmem>>, vector<1x128xf32>
    tpu.vector_store %arg14[%c0_31, %c0_32], %45 {strides = array<i32>} : memref<1x128xf32, #tpu.memory_space<vmem>>, vector<1x128xf32>,
    return
  }
  func.func @transform_0(%arg0: i32) -> (i32, i32) {
    %c0_i32 = arith.constant 0 : i32
    %c0_i32_0 = arith.constant 0 : i32
    return %arg0, %c0_i32 : i32, i32
  }
  func.func @transform_1(%arg0: i32) -> (i32, i32) {
    %c0_i32 = arith.constant 0 : i32
    %c0_i32_0 = arith.constant 0 : i32
    %c0_i32_1 = arith.constant 0 : i32
    return %c0_i32, %c0_i32_0 : i32, i32
  }
  func.func @transform_2(%arg0: i32) -> (i32, i32) {
    %c0_i32 = arith.constant 0 : i32
    %c0_i32_0 = arith.constant 0 : i32
    %c0_i32_1 = arith.constant 0 : i32
    return %c0_i32, %c0_i32_0 : i32, i32
  }
  func.func @transform_3(%arg0: i32) -> (i32, i32) {
    %c0_i32 = arith.constant 0 : i32
    %c0_i32_0 = arith.constant 0 : i32
    %c0_i32_1 = arith.constant 0 : i32
    return %c0_i32, %c0_i32_0 : i32, i32
  }
  func.func @transform_4(%arg0: i32) -> (i32, i32) {
    %c0_i32 = arith.constant 0 : i32
    %c0_i32_0 = arith.constant 0 : i32
    %c0_i32_1 = arith.constant 0 : i32
    return %c0_i32, %c0_i32_0 : i32, i32
  }
  func.func @transform_5(%arg0: i32) -> (i32, i32) {
    %c0_i32 = arith.constant 0 : i32
    %c0_i32_0 = arith.constant 0 : i32
    %c0_i32_1 = arith.constant 0 : i32
    return %c0_i32, %c0_i32_0 : i32, i32
  }
  func.func @transform_6(%arg0: i32) -> (i32, i32) {
    %c0_i32 = arith.constant 0 : i32
    %c0_i32_0 = arith.constant 0 : i32
    %c0_i32_1 = arith.constant 0 : i32
    return %c0_i32, %c0_i32_0 : i32, i32
  }
  func.func @transform_7(%arg0: i32) -> (i32, i32) {
    %c0_i32 = arith.constant 0 : i32
    %c0_i32_0 = arith.constant 0 : i32
    %c0_i32_1 = arith.constant 0 : i32
    return %c0_i32, %c0_i32_0 : i32, i32
  }
  func.func @transform_8(%arg0: i32) -> (i32, i32) {
    %c0_i32 = arith.constant 0 : i32
    %c0_i32_0 = arith.constant 0 : i32
    %c0_i32_1 = arith.constant 0 : i32
    return %c0_i32, %c0_i32_0 : i32, i32
  }
  func.func @transform_9(%arg0: i32) -> (i32, i32) {
    %c0_i32 = arith.constant 0 : i32
    %c0_i32_0 = arith.constant 0 : i32
    %c0_i32_1 = arith.constant 0 : i32
    return %c0_i32, %c0_i32_0 : i32, i32
  }
  func.func @transform_10(%arg0: i32) -> (i32, i32) {
    %c0_i32 = arith.constant 0 : i32
    %c0_i32_0 = arith.constant 0 : i32
    %c0_i32_1 = arith.constant 0 : i32
    return %c0_i32, %c0_i32_0 : i32, i32
  }
  func.func @transform_11(%arg0: i32) -> (i32, i32) {
    %c0_i32 = arith.constant 0 : i32
    %c0_i32_0 = arith.constant 0 : i32
    %c0_i32_1 = arith.constant 0 : i32
    return %c0_i32, %c0_i32_0 : i32, i32
  }
  func.func @transform_12(%arg0: i32) -> (i32, i32) {
    %c0_i32 = arith.constant 0 : i32
    %c0_i32_0 = arith.constant 0 : i32
    %c0_i32_1 = arith.constant 0 : i32
    return %c0_i32, %c0_i32_0 : i32, i32
  }
  func.func @transform_13(%arg0: i32) -> (i32, i32) {
    %c0_i32 = arith.constant 0 : i32
    %c0_i32_0 = arith.constant 0 : i32
    return %c0_i32, %arg0 : i32, i32
  }
}

</mosaic_0001>

<bundles_post_ra>
// kernel: tpu_custom_call.1
= control target key start
LH: loop header
LB: loop body
LE: loop exit
PB: predicated region body
PF: predicated region fallthrough
CT: control target
= control target key end

     0   :  { %s2207_s0 = inlined_call_operand.vmem [shape: bf16[128,8], index: 0, kind: input, shape index: {}]   ;;  %s2208_s1 = inlined_call_operand.vmem [shape: bf16[8,256], index: 1, kind: input, shape index: {}]   ;;  %s2209_s2 = inlined_call_operand.hbm [shape: f32[1,256], index: 2, kind: input, shape index: {}]   ;;  %s2210_s3 = inlined_call_operand.vmem [shape: bf16[256,128], index: 3, kind: input, shape index: {}]   ;;  %s2211_s4 = inlined_call_operand.hbm [shape: f32[1,128], index: 4, kind: input, shape index: {}]   ;;  %s2212_s5 = inlined_call_operand.vmem [shape: bf16[128,6], index: 5, kind: input, shape index: {}]   ;;  %s2213_s6 = inlined_call_operand.hbm [shape: f32[1,6], index: 6, kind: input, shape index: {}]   ;;  %s2214_s7 = inlined_call_operand.vmem [shape: bf16[6,128], index: 7, kind: input, shape index: {}]   ;;  %s2215_s8 = inlined_call_operand.vmem [shape: f32[1,128], index: 8, kind: input, shape index: {}]   ;;  %s2216_s9 = inlined_call_operand.hbm [shape: bf16[128,256], index: 9, kind: input, shape index: {}]   ;;  %s2217_s10 = inlined_call_operand.vmem [shape: f32[1,256], index: 10, kind: input, shape index: {}]   ;;  %s2218_s11 = inlined_call_operand.vmem [shape: bf16[1,256], index: 11, kind: input, shape index: {}]   ;;  %s2219_s12 = inlined_call_operand.<no memory space> [shape: f32[1,1], index: 12, kind: input, shape index: {}]   ;;  %s2220_s13 = inlined_call_operand.hbm [shape: f32[1,128], index: 13, kind: output, shape index: {}]  }
   0x1   :  { %v18_v0 = vstv %s2219_s12 }
   0x2   :  { %19 = vst [vmem:[#allocation2] sm:$0x1] %v18_v0 }
   0x3   :  { %20 = vsyncpa [#allocation4], 0 }
   0x4   :  { %21 = vsyncpa [#allocation7], 0 }
   0x5   :  { %22 = vsyncpa [#allocation10], 0 }
   0x6   :  { %23 = vsyncpa [#allocation5], 0  ;;  %s1787_s27 = smov [#allocation6]   ;;  %s1788_s29 = smov [#allocation3]  }
   0x7   :  { %s46_s28 = sshll.u32 %s1787_s27, 4  ;;  %s34_s30 = sshll.u32 %s1788_s29, 4  ;;  %s47_s28 = int_to_ptr.vmem [resolvable:$true] %s46_s28  ;;  %s35_s30 = int_to_ptr.vmem [resolvable:$true] %s34_s30 }
   0x8   :  { %s1687_s14 = scalar_lea.vmem %s47_s28, 16  ;;  %s1691_s15 = scalar_lea.vmem %s47_s28, 32 }
   0x9   :  { %p1688_p0 = scmp.ne.s32.totalorder %s47_s28, %s1687_s14  ;;  %p1692_p1 = scmp.lt.s32.totalorder %s47_s28, %s47_s28 }
   0xa   :  { %p1693_p2 = scmp.lt.s32.totalorder %s1691_s15, %s1687_s14 }
   0xc   :  { %p1694_p3 = por %p1693_p2, %p1692_p1 }
   0xe   :  { %p1695_p4 = pnand %p1694_p3, %p1688_p0 }
  0x10   :  { %1698 = shalt.err (!%p1695_p4)
}
  0x11   :  { %49 = dma.hbm_to_vmem [thread:$0]  %s2211_s4, 16, %s47_s28, [#allocation7]  }
  0x12   :  { %s1707_s17 = scalar_lea.vmem %s35_s30, 32  ;;  %p1712_p6 = scmp.lt.s32.totalorder %s35_s30, %s35_s30 }
  0x13   :  { %p1708_p5 = scmp.ne.s32.totalorder %s35_s30, %s1707_s17  ;;  %p1713_p7 = scmp.lt.s32.totalorder %s1707_s17, %s1707_s17 }
  0x15   :  { %p1714_p8 = por %p1713_p7, %p1712_p6 }
  0x17   :  { %p1715_p9 = pnand %p1714_p8, %p1708_p5 }
  0x19   :  { %1718 = shalt.err (!%p1715_p9)
}
  0x1a   :  { %37 = dma.hbm_to_vmem [thread:$0]  %s2209_s2, 32, %s35_s30, [#allocation4]  }
  0x1b   :  { %s1789_s20 = smov [#allocation8]   ;;  %s1790_s22 = smov [#allocation9]  }
  0x1c   :  { %s58_s21 = sshll.u32 %s1789_s20, 4  ;;  %s71_s23 = sshll.u32 %s1790_s22, 4  ;;  %s59_s21 = int_to_ptr.vmem [resolvable:$true] %s58_s21  ;;  %s72_s23 = int_to_ptr.vmem [resolvable:$true] %s71_s23 }
  0x1d   :  { %s1727_s24 = scalar_lea.vmem %s59_s21, 16  ;;  %s1731_s4 = scalar_lea.vmem %s59_s21, 32 }
  0x1e   :  { %p1728_p10 = scmp.ne.s32.totalorder %s59_s21, %s1727_s24  ;;  %p1732_p11 = scmp.lt.s32.totalorder %s59_s21, %s59_s21 }
  0x1f   :  { %p1733_p12 = scmp.lt.s32.totalorder %s1731_s4, %s1727_s24 }
  0x21   :  { %p1734_p13 = por %p1733_p12, %p1732_p11 }
  0x23   :  { %p1735_p0 = pnand %p1734_p13, %p1728_p10 }
  0x25   :  { %1738 = shalt.err (!%p1735_p0)
}
  0x26   :  { %61 = dma.hbm_to_vmem [thread:$0]  %s2213_s6, 16, %s59_s21, [#allocation7]  }
  0x27   :  { %s1747_s27 = scalar_lea.vmem %s72_s23, 2048  ;;  %p1752_p2 = scmp.lt.s32.totalorder %s72_s23, %s72_s23 }
  0x28   :  { %p1748_p1 = scmp.ne.s32.totalorder %s72_s23, %s1747_s27  ;;  %p1753_p3 = scmp.lt.s32.totalorder %s1747_s27, %s1747_s27 }
  0x2a   :  { %p1754_p4 = por %p1753_p3, %p1752_p2 }
  0x2c   :  { %p1755_p5 = pnand %p1754_p4, %p1748_p1 }
  0x2e   :  { %1758 = shalt.err (!%p1755_p5)
}
  0x2f   :  { %s1791_s2 = smov 128   ;;  %s1792_s28 = smov 8  }
  0x30   :  { %77 = dma.hbm_to_vmem [thread:$0]  %s2216_s9, 2048, %s72_s23, [#allocation10], %s1791_s2, %s1791_s2, %s1792_s28  }
  0x31   :  { %1779 = dma.done.wait [#allocation4], 32  }
  0x32   :  { %1780 = vsyncadd [#allocation4], 4294967264 }
  0x33   :  { %1781 = dma.done.wait [#allocation7], 32  }
  0x34   :  { %1782 = vsyncadd [#allocation7], 4294967264 }
  0x35   :  { %1783 = dma.done.wait [#allocation10], 2048  }
  0x36   :  { %1784 = vsyncadd [#allocation10], 4294965248  ;;  %v1793_v1 = vmov 0   ;;  %v113_v2 = vld [vmem:[%s2208_s1] sm:$0xff]  ;;  %vm196_vm0 = vcmask 1043456   ;;  %vm171_vm1 = vcmask 64512   ;;  %v116_v34 = vlaneseq }
  0x37   :  { %235 = vmatprep.mubr.bf16.mxu0 %v1793_v1  ;;  %1504 = vset.pattern.permute.xlu0 %v1793_v1  ;;  %v1292_v3 = vcombine.high %v113_v2, %v113_v2  ;;  %v1291_v4 = vcombine.low %v113_v2, %v113_v2  ;;  %v1507_v6 = vld [vmem:[%s2207_s0] sm:$0xff]   ;;  %v1515_v7 = vld [vmem:[%s2210_s3 + $0x78] sm:$0xff]   ;;  %v1508_v9 = vld [vmem:[%s2207_s0 + $0x8] sm:$0xff]   ;;  %vm813_vm2 = vcmask 1042432   ;;  %vm788_vm3 = vcmask 48128  }
  0x38   :  { %v1516_v8 = vld [vmem:[%s2210_s3 + $0x38] sm:$0xff]   ;;  %1355 = vmatprep.subr.bf16.mxu1 %v1515_v7  ;;  %v1517_v10 = vld [vmem:[%s2210_s3 + $0x70] sm:$0xff]   ;;  %v1511_v13 = vld [vmem:[%s2207_s0 + $0x20] sm:$0xff]   ;;  %v1985_v35 = vshrl.u32 %v116_v34, 7 }
  0x39   :  { %1293 = vmatprep.subr.msk.bf16.mxu0 %vm196_vm0, %v1292_v3  ;;  %v198_v5 = vsel %vm196_vm0, %v1291_v4, 0  ;;  %1356 = vmatpush3.bf16.msra.mxu1 %v1516_v8  ;;  %v1509_v11 = vld [vmem:[%s2207_s0 + $0x10] sm:$0xff]   ;;  %v1510_v12 = vld [vmem:[%s2207_s0 + $0x18] sm:$0xff]   ;;  %v1512_v14 = vld [vmem:[%s2207_s0 + $0x28] sm:$0xff]  }
  0x3a   :  { %218 = vmatpush1.bf16.msra.mxu0 %v198_v5  ;;  %1357 = vmatprep.subr.bf16.mxu1 %v1517_v10  ;;  %v1513_v15 = vld [vmem:[%s2207_s0 + $0x30] sm:$0xff]   ;;  %v1514_v16 = vld [vmem:[%s2207_s0 + $0x38] sm:$0xff]   ;;  %v1519_v18 = vld [vmem:[%s2210_s3 + $0x68] sm:$0xff]   ;;  %v1988_v36 = vsub.s32 0, %v1985_v35  ;;  %v122_v38 = vsub.s32 1, %v1985_v35 }
  0x3b   :  { %v1518_v17 = vld [vmem:[%s2210_s3 + $0x30] sm:$0xff]   ;;  %v1520_v19 = vld [vmem:[%s2210_s3 + $0x28] sm:$0xff]   ;;  %v1521_v20 = vld [vmem:[%s2210_s3 + $0x60] sm:$0xff]  }
  0x3c   :  { %v1522_v21 = vld [vmem:[%s2210_s3 + $0x20] sm:$0xff]   ;;  %v1523_v22 = vld [vmem:[%s2210_s3 + $0x58] sm:$0xff]   ;;  %v1525_v24 = vld [vmem:[%s2210_s3 + $0x50] sm:$0xff]  }
  0x3d   :  { %1294 = vmatmul.mubr.msk.bf16.vlgmr.msra.gmra.mxu0 %vm171_vm1, %v1507_v6  ;;  %1358 = vmatpush3.bf16.msra.mxu1 %v1518_v17  ;;  %v1524_v23 = vld [vmem:[%s2210_s3 + $0x18] sm:$0xff]   ;;  %v1526_v25 = vld [vmem:[%s2210_s3 + $0x10] sm:$0xff]   ;;  %v1527_v26 = vld [vmem:[%s2210_s3 + $0x48] sm:$0xff]  }
  0x3e   :  { %245 = vmatprep.mubr.bf16.mxu0 %v1793_v1  ;;  %1359 = vmatprep.subr.bf16.mxu1 %v1519_v18  ;;  %v1528_v27 = vld [vmem:[%s2210_s3 + $0x8] sm:$0xff]   ;;  %v1529_v28 = vld [vmem:[%s2210_s3 + $0x40] sm:$0xff]   ;;  %v1531_v30 = vld [vmem:[%s2212_s5 + $0x38] sm:$0xff]  }
  0x3f   :  { %v1530_v29 = vld [vmem:[%s2210_s3] sm:$0xff]   ;;  %v1532_v31 = vld [vmem:[%s2212_s5 + $0x30] sm:$0xff]   ;;  %1444 = vmatprep.subr.bf16.mxu0 %v1531_v30  ;;  %v1533_v32 = vld [vmem:[%s2212_s5 + $0x28] sm:$0xff]  }
  0x40   :  { %1445 = vmatpush3.bf16.msra.mxu0 %v1531_v30  ;;  %v1534_v33 = vld [vmem:[%s2212_s5 + $0x20] sm:$0xff]  }
  0x41   :  { %1360 = vmatpush3.bf16.msra.mxu1 %v1520_v19  ;;  %1446 = vmatprep.subr.bf16.mxu0 %v1532_v31  ;;  %v114_v37 = vld [vmem:[#allocation3] sm:$0x3] }
  0x42   :  { %1361 = vmatprep.subr.bf16.mxu1 %v1521_v20  ;;  %v1992_v40 = vrot.slane %v114_v37, %v1988_v36  ;;  %v1996_v42 = vrot.slane %v114_v37, %v122_v38 }
  0x44   :  { %1447 = vmatpush3.bf16.msra.mxu0 %v1532_v31 }
  0x45   :  { %1295 = vmatmul.mubr.msk.bf16.gmra.mxu0 %vm171_vm1, %v1508_v9  ;;  %1362 = vmatpush3.bf16.msra.mxu1 %v1522_v21 }
  0x46   :  { %255 = vmatprep.mubr.bf16.mxu0 %v1793_v1  ;;  %1363 = vmatprep.subr.bf16.mxu1 %v1523_v22 }
  0x47   :  { %1448 = vmatprep.subr.bf16.mxu0 %v1533_v32 }
  0x48   :  { %1449 = vmatpush3.bf16.msra.mxu0 %v1533_v32 }
  0x49   :  { %1364 = vmatpush3.bf16.msra.mxu1 %v1524_v23  ;;  %1450 = vmatprep.subr.bf16.mxu0 %v1534_v33 }
  0x4a   :  { %1365 = vmatprep.subr.bf16.mxu1 %v1525_v24 }
  0x4c   :  { %1451 = vmatpush3.bf16.msra.mxu0 %v1534_v33 }
  0x4d   :  { %1296 = vmatmul.mubr.msk.bf16.gmra.mxu0 %vm171_vm1, %v1509_v11  ;;  %1366 = vmatpush3.bf16.msra.mxu1 %v1526_v25 }
  0x4e   :  { %265 = vmatprep.mubr.bf16.mxu0 %v1793_v1  ;;  %1367 = vmatprep.subr.bf16.mxu1 %v1527_v26 }
  0x51   :  { %1368 = vmatpush3.bf16.msra.mxu1 %v1528_v27 }
  0x52   :  { %1369 = vmatprep.subr.bf16.mxu1 %v1529_v28 }
  0x55   :  { %1297 = vmatmul.mubr.msk.bf16.gmra.mxu0 %vm171_vm1, %v1510_v12  ;;  %1370 = vmatpush3.bf16.msra.mxu1 %v1530_v29 }
  0x56   :  { %275 = vmatprep.mubr.bf16.mxu0 %v1793_v1 }
  0x5d   :  { %1298 = vmatmul.mubr.msk.bf16.gmra.mxu0 %vm171_vm1, %v1511_v13 }
  0x5e   :  { %285 = vmatprep.mubr.bf16.mxu0 %v1793_v1 }
  0x65   :  { %1299 = vmatmul.mubr.msk.bf16.gmra.mxu0 %vm171_vm1, %v1512_v14 }
  0x66   :  { %295 = vmatprep.mubr.bf16.mxu0 %v1793_v1 }
  0x6d   :  { %1300 = vmatmul.mubr.msk.bf16.gmra.mxu0 %vm171_vm1, %v1513_v15 }
  0x6e   :  { %305 = vmatprep.mubr.bf16.mxu0 %v1793_v1 }
  0x75   :  { %1301 = vmatmul.mubr.msk.bf16.gmra.mxu0 %vm171_vm1, %v1514_v16 }
  0xfd   :  { %v237_v39 = vpop.f32.mrf.mxu0 }
  0xfe   :  { %v238_v45 = vadd.f32 %v237_v39, %v1992_v40 }
  0xff   :  { %v239_v41 = vpop.f32.mrf.mxu0 }
 0x100   :  { %v240_v47 = vadd.f32 %v239_v41, %v1996_v42 }
 0x101   :  { %v241_v43 = vpop.f32.mrf.mxu0 }
 0x102   :  { %v242_v44 = vadd.f32 %v241_v43, %v1992_v40 }
 0x103   :  { %v243_v46 = vpop.f32.mrf.mxu0 }
 0x104   :  { %v244_v48 = vadd.f32 %v243_v46, %v1996_v42  ;;  %v316_v49 = vpack.c.bf16 %v242_v44, %v238_v45 }
 0x105   :  { %v247_v50 = vpop.f32.mrf.mxu0 }
 0x106   :  { %v317_v51 = vpack.c.bf16 %v244_v48, %v240_v47  ;;  %v248_v55 = vadd.f32 %v247_v50, %v1992_v40 }
 0x107   :  { %v249_v52 = vpop.f32.mrf.mxu0 }
 0x108   :  { %1563 = vtanh.bf16 %v317_v51  ;;  %v250_v57 = vadd.f32 %v249_v52, %v1996_v42 }
 0x109   :  { %1565 = vtanh.bf16 %v316_v49  ;;  %v251_v53 = vpop.f32.mrf.mxu0 }
 0x10a   :  { %v252_v54 = vadd.f32 %v251_v53, %v1992_v40 }
 0x10b   :  { %v253_v56 = vpop.f32.mrf.mxu0 }
 0x10c   :  { %v254_v58 = vadd.f32 %v253_v56, %v1996_v42  ;;  %v318_v59 = vpack.c.bf16 %v252_v54, %v248_v55 }
 0x10d   :  { %v257_v60 = vpop.f32.mrf.mxu0 }
 0x10e   :  { %v319_v61 = vpack.c.bf16 %v254_v58, %v250_v57  ;;  %v258_v2 = vadd.f32 %v257_v60, %v1992_v40 }
 0x10f   :  { %v259_v62 = vpop.f32.mrf.mxu0 }
 0x110   :  { %1567 = vtanh.bf16 %v319_v61  ;;  %v260_v4 = vadd.f32 %v259_v62, %v1996_v42 }
 0x111   :  { %1569 = vtanh.bf16 %v318_v59  ;;  %v261_v63 = vpop.f32.mrf.mxu0 }
 0x112   :  { %v262_v0 = vadd.f32 %v261_v63, %v1992_v40 }
 0x113   :  { %v263_v3 = vpop.f32.mrf.mxu0 }
 0x114   :  { %v264_v5 = vadd.f32 %v263_v3, %v1996_v42  ;;  %v320_v6 = vpack.c.bf16 %v262_v0, %v258_v2 }
 0x115   :  { %v267_v7 = vpop.f32.mrf.mxu0 }
 0x116   :  { %v1564_v8 = vpop.eup %1563  ;;  %v321_v9 = vpack.c.bf16 %v264_v5, %v260_v4  ;;  %v268_v14 = vadd.f32 %v267_v7, %v1992_v40 }
 0x117   :  { %v1566_v10 = vpop.eup %1565  ;;  %v269_v11 = vpop.f32.mrf.mxu0  ;;  %515 = vmatprep.mubr.bf16.mxu1 %v1564_v8 }
 0x118   :  { %1571 = vtanh.bf16 %v321_v9  ;;  %516 = vmatmul.mubr.bf16.vlgmr.msra.gmra.mxu1 %v1566_v10  ;;  %v270_v16 = vadd.f32 %v269_v11, %v1996_v42 }
 0x119   :  { %1573 = vtanh.bf16 %v320_v6  ;;  %v271_v12 = vpop.f32.mrf.mxu0 }
 0x11a   :  { %v272_v13 = vadd.f32 %v271_v12, %v1992_v40 }
 0x11b   :  { %v273_v15 = vpop.f32.mrf.mxu0 }
 0x11c   :  { %v274_v17 = vadd.f32 %v273_v15, %v1996_v42  ;;  %v322_v18 = vpack.c.bf16 %v272_v13, %v268_v14 }
 0x11d   :  { %v277_v19 = vpop.f32.mrf.mxu0 }
 0x11e   :  { %v1568_v20 = vpop.eup %1567  ;;  %v323_v21 = vpack.c.bf16 %v274_v17, %v270_v16  ;;  %v278_v26 = vadd.f32 %v277_v19, %v1992_v40  ;;  %v1537_v16 = vld [vmem:[%s2212_s5 + $0x8] sm:$0xff]   ;;  %v1538_v17 = vld [vmem:[%s2212_s5] sm:$0xff]  }
 0x11f   :  { %v1570_v22 = vpop.eup %1569  ;;  %v279_v23 = vpop.f32.mrf.mxu0  ;;  %523 = vmatprep.mubr.bf16.mxu1 %v1568_v20 }
 0x120   :  { %1575 = vtanh.bf16 %v323_v21  ;;  %524 = vmatmul.mubr.bf16.gmra.mxu1 %v1570_v22  ;;  %v280_v28 = vadd.f32 %v279_v23, %v1996_v42 }
 0x121   :  { %1577 = vtanh.bf16 %v322_v18  ;;  %v281_v24 = vpop.f32.mrf.mxu0  ;;  %v780_v18 = vld [vmem:[%s2214_s7] sm:$0x7] }
 0x122   :  { %v282_v25 = vadd.f32 %v281_v24, %v1992_v40  ;;  %1494 = vmatprep.subr.msk.bf16.mxu1 %vm813_vm2, %v780_v18  ;;  %v815_v19 = vsel %vm813_vm2, %v780_v18, 0  ;;  %v2045_v24 = vld [vmem:[#allocation6] ss:$0 sm:$0xff] }
 0x123   :  { %v283_v27 = vpop.f32.mrf.mxu0  ;;  %1477 = vmatpush3.bf16.msra.mxu1 %v815_v19 }
 0x124   :  { %v284_v29 = vadd.f32 %v283_v27, %v1996_v42  ;;  %v324_v30 = vpack.c.bf16 %v282_v25, %v278_v26 }
 0x125   :  { %v287_v31 = vpop.f32.mrf.mxu0 }
 0x126   :  { %v1572_v32 = vpop.eup %1571  ;;  %v325_v33 = vpack.c.bf16 %v284_v29, %v280_v28  ;;  %v288_v43 = vadd.f32 %v287_v31, %v1992_v40 }
 0x127   :  { %v1574_v34 = vpop.eup %1573  ;;  %v289_v37 = vpop.f32.mrf.mxu0  ;;  %531 = vmatprep.mubr.bf16.mxu1 %v1572_v32 }
 0x128   :  { %1579 = vtanh.bf16 %v325_v33  ;;  %532 = vmatmul.mubr.bf16.gmra.mxu1 %v1574_v34  ;;  %v290_v45 = vadd.f32 %v289_v37, %v1996_v42 }
 0x129   :  { %1581 = vtanh.bf16 %v324_v30  ;;  %v291_v39 = vpop.f32.mrf.mxu0 }
 0x12a   :  { %v292_v41 = vadd.f32 %v291_v39, %v1992_v40 }
 0x12b   :  { %v293_v44 = vpop.f32.mrf.mxu0 }
 0x12c   :  { %v294_v46 = vadd.f32 %v293_v44, %v1996_v42  ;;  %v326_v47 = vpack.c.bf16 %v292_v41, %v288_v43 }
 0x12d   :  { %v297_v48 = vpop.f32.mrf.mxu0 }
 0x12e   :  { %v1576_v49 = vpop.eup %1575  ;;  %v327_v50 = vpack.c.bf16 %v294_v46, %v290_v45  ;;  %v298_v55 = vadd.f32 %v297_v48, %v1992_v40 }
 0x12f   :  { %v1578_v51 = vpop.eup %1577  ;;  %v299_v52 = vpop.f32.mrf.mxu0  ;;  %539 = vmatprep.mubr.bf16.mxu1 %v1576_v49 }
 0x130   :  { %1583 = vtanh.bf16 %v327_v50  ;;  %540 = vmatmul.mubr.bf16.gmra.mxu1 %v1578_v51  ;;  %v300_v57 = vadd.f32 %v299_v52, %v1996_v42 }
 0x131   :  { %1585 = vtanh.bf16 %v326_v47  ;;  %v301_v53 = vpop.f32.mrf.mxu0 }
 0x132   :  { %v302_v54 = vadd.f32 %v301_v53, %v1992_v40 }
 0x133   :  { %v303_v56 = vpop.f32.mrf.mxu0 }
 0x134   :  { %v304_v58 = vadd.f32 %v303_v56, %v1996_v42  ;;  %v328_v59 = vpack.c.bf16 %v302_v54, %v298_v55 }
 0x135   :  { %v307_v60 = vpop.f32.mrf.mxu0 }
 0x136   :  { %v1580_v61 = vpop.eup %1579  ;;  %v329_v62 = vpack.c.bf16 %v304_v58, %v300_v57  ;;  %v308_v4 = vadd.f32 %v307_v60, %v1992_v40 }
 0x137   :  { %v1582_v63 = vpop.eup %1581  ;;  %v309_v0 = vpop.f32.mrf.mxu0  ;;  %547 = vmatprep.mubr.bf16.mxu1 %v1580_v61 }
 0x138   :  { %1587 = vtanh.bf16 %v329_v62  ;;  %548 = vmatmul.mubr.bf16.gmra.mxu1 %v1582_v63  ;;  %v310_v6 = vadd.f32 %v309_v0, %v1996_v42 }
 0x139   :  { %1589 = vtanh.bf16 %v328_v59  ;;  %v311_v2 = vpop.f32.mrf.mxu0 }
 0x13a   :  { %v312_v3 = vadd.f32 %v311_v2, %v1992_v40  ;;  %v1535_v40 = vld [vmem:[%s2212_s5 + $0x18] sm:$0xff]  }
 0x13b   :  { %v313_v5 = vpop.f32.mrf.mxu0  ;;  %1452 = vmatprep.subr.bf16.mxu0 %v1535_v40 }
 0x13c   :  { %v314_v7 = vadd.f32 %v313_v5, %v1996_v42  ;;  %v330_v8 = vpack.c.bf16 %v312_v3, %v308_v4  ;;  %1453 = vmatpush3.bf16.msra.mxu0 %v1535_v40  ;;  %v1536_v42 = vld [vmem:[%s2212_s5 + $0x10] sm:$0xff]  }
 0x13d   :  { %1454 = vmatprep.subr.bf16.mxu0 %v1536_v42 }
 0x13e   :  { %v1584_v9 = vpop.eup %1583  ;;  %v331_v10 = vpack.c.bf16 %v314_v7, %v310_v6 }
 0x13f   :  { %v1586_v11 = vpop.eup %1585  ;;  %555 = vmatprep.mubr.bf16.mxu1 %v1584_v9 }
 0x140   :  { %1591 = vtanh.bf16 %v331_v10  ;;  %556 = vmatmul.mubr.bf16.gmra.mxu1 %v1586_v11  ;;  %1455 = vmatpush3.bf16.msra.mxu0 %v1536_v42 }
 0x141   :  { %1593 = vtanh.bf16 %v330_v8  ;;  %1456 = vmatprep.subr.bf16.mxu0 %v1537_v16 }
 0x144   :  { %1457 = vmatpush3.bf16.msra.mxu0 %v1537_v16 }
 0x145   :  { %1458 = vmatprep.subr.bf16.mxu0 %v1538_v17 }
 0x146   :  { %v1588_v12 = vpop.eup %1587 }
 0x147   :  { %v1590_v13 = vpop.eup %1589  ;;  %563 = vmatprep.mubr.bf16.mxu1 %v1588_v12 }
 0x148   :  { %564 = vmatmul.mubr.bf16.gmra.mxu1 %v1590_v13  ;;  %1459 = vmatpush3.bf16.msra.mxu0 %v1538_v17 }
 0x14e   :  { %v1592_v14 = vpop.eup %1591 }
 0x14f   :  { %v1594_v15 = vpop.eup %1593  ;;  %571 = vmatprep.mubr.bf16.mxu1 %v1592_v14 }
 0x150   :  { %572 = vmatmul.mubr.bf16.gmra.mxu1 %v1594_v15 }
 0x1d8   :  { %v1371_v20 = vpop.f32.mrf.mxu1 }
 0x1da   :  { %v1372_v21 = vpop.f32.mrf.mxu1 }
 0x1db   :  { %v1373_v23 = vadd.f32 %v1372_v21, %v1371_v20 }
 0x1dc   :  { %v1374_v22 = vpop.f32.mrf.mxu1 }
 0x1dd   :  { %v518_v28 = vadd.f32 %v1373_v23, %v2045_v24 }
 0x1de   :  { %v1375_v25 = vpop.f32.mrf.mxu1 }
 0x1df   :  { %v1376_v26 = vadd.f32 %v1375_v25, %v1374_v22 }
 0x1e0   :  { %v1377_v27 = vpop.f32.mrf.mxu1 }
 0x1e1   :  { %v521_v29 = vadd.f32 %v1376_v26, %v2045_v24 }
 0x1e2   :  { %v1378_v30 = vpop.f32.mrf.mxu1 }
 0x1e3   :  { %v580_v31 = vpack.c.bf16 %v521_v29, %v518_v28  ;;  %v1379_v33 = vadd.f32 %v1378_v30, %v1377_v27 }
 0x1e4   :  { %v1380_v32 = vpop.f32.mrf.mxu1 }
 0x1e5   :  { %1595 = vtanh.bf16 %v580_v31  ;;  %v526_v41 = vadd.f32 %v1379_v33, %v2045_v24 }
 0x1e6   :  { %v1381_v34 = vpop.f32.mrf.mxu1 }
 0x1e7   :  { %v1382_v37 = vadd.f32 %v1381_v34, %v1380_v32 }
 0x1e8   :  { %v1383_v39 = vpop.f32.mrf.mxu1 }
 0x1e9   :  { %v529_v43 = vadd.f32 %v1382_v37, %v2045_v24 }
 0x1ea   :  { %v1384_v44 = vpop.f32.mrf.mxu1 }
 0x1eb   :  { %v581_v45 = vpack.c.bf16 %v529_v43, %v526_v41  ;;  %v1385_v47 = vadd.f32 %v1384_v44, %v1383_v39 }
 0x1ec   :  { %v1386_v46 = vpop.f32.mrf.mxu1 }
 0x1ed   :  { %1597 = vtanh.bf16 %v581_v45  ;;  %v534_v51 = vadd.f32 %v1385_v47, %v2045_v24  ;;  %v1539_v47 = vld [vmem:[#allocation9 + $0x70] ss:$8 sps:$4 sm:$0xff]  }
 0x1ee   :  { %v1387_v48 = vpop.f32.mrf.mxu1 }
 0x1ef   :  { %v1388_v49 = vadd.f32 %v1387_v48, %v1386_v46  ;;  %v1541_v48 = vld [vmem:[#allocation9 + $0x74] ss:$8 sps:$4 sm:$0xff]  }
 0x1f0   :  { %v1389_v50 = vpop.f32.mrf.mxu1  ;;  %1038 = vmatprep.subr.bf16.mxu0 %v1541_v48  ;;  %v1559_v48 = vld [vmem:[#allocation9 + $0x14] ss:$8 sps:$4 sm:$0xff]  }
 0x1f1   :  { %v537_v52 = vadd.f32 %v1388_v49, %v2045_v24  ;;  %v1544_v49 = vld [vmem:[#allocation9 + $0x64] ss:$8 sps:$4 sm:$0xff]  }
 0x1f2   :  { %v1390_v53 = vpop.f32.mrf.mxu1 }
 0x1f3   :  { %v1596_v54 = vpop.eup %1595  ;;  %v582_v55 = vpack.c.bf16 %v537_v52, %v534_v51  ;;  %v1391_v57 = vadd.f32 %v1390_v53, %v1389_v50  ;;  %v1542_v50 = vld [vmem:[#allocation9 + $0x60] ss:$8 sps:$4 sm:$0xff]   ;;  %v1319_v52 = vld [vmem:[#allocation8] ss:$0 sm:$0xff] }
 0x1f4   :  { %v1392_v56 = vpop.f32.mrf.mxu1  ;;  %1460 = vmatprep.mubr.bf16.mxu0 %v1596_v54 }
 0x1f5   :  { %1599 = vtanh.bf16 %v582_v55  ;;  %v542_v61 = vadd.f32 %v1391_v57, %v2045_v24 }
 0x1f6   :  { %v1393_v58 = vpop.f32.mrf.mxu1 }
 0x1f7   :  { %v1394_v59 = vadd.f32 %v1393_v58, %v1392_v56 }
 0x1f8   :  { %v1395_v60 = vpop.f32.mrf.mxu1 }
 0x1f9   :  { %v545_v62 = vadd.f32 %v1394_v59, %v2045_v24 }
 0x1fa   :  { %v1396_v63 = vpop.f32.mrf.mxu1 }
 0x1fb   :  { %v1598_v0 = vpop.eup %1597  ;;  %v583_v2 = vpack.c.bf16 %v545_v62, %v542_v61  ;;  %v1397_v4 = vadd.f32 %v1396_v63, %v1395_v60 }
 0x1fc   :  { %v1398_v3 = vpop.f32.mrf.mxu1  ;;  %1461 = vmatmul.mubr.bf16.vlgmr.msra.gmra.mxu0 %v1598_v0 }
 0x1fd   :  { %1601 = vtanh.bf16 %v583_v2  ;;  %v550_v8 = vadd.f32 %v1397_v4, %v2045_v24  ;;  %1039 = vmatpush1.bf16.msra.mxu0 %v1539_v47  ;;  %v1556_v47 = vld [vmem:[#allocation9 + $0x24] ss:$8 sps:$4 sm:$0xff]  }
 0x1fe   :  { %v1399_v5 = vpop.f32.mrf.mxu1  ;;  %1040 = vmatprep.subr.bf16.mxu0 %v1544_v49  ;;  %v1557_v49 = vld [vmem:[#allocation9 + $0x10] ss:$8 sps:$4 sm:$0xff]  }
 0x1ff   :  { %v1400_v6 = vadd.f32 %v1399_v5, %v1398_v3 }
 0x200   :  { %v1401_v7 = vpop.f32.mrf.mxu1 }
 0x201   :  { %v553_v9 = vadd.f32 %v1400_v6, %v2045_v24  ;;  %1041 = vmatpush1.bf16.msra.mxu0 %v1542_v50  ;;  %v1562_v50 = vld [vmem:[#allocation9 + $0x4] ss:$8 sps:$4 sm:$0xff]  }
 0x202   :  { %v1402_v10 = vpop.f32.mrf.mxu1 }
 0x203   :  { %v1600_v11 = vpop.eup %1599  ;;  %v584_v12 = vpack.c.bf16 %v553_v9, %v550_v8  ;;  %v1403_v14 = vadd.f32 %v1402_v10, %v1401_v7 }
 0x204   :  { %v1404_v13 = vpop.f32.mrf.mxu1  ;;  %1464 = vmatprep.mubr.bf16.mxu0 %v1600_v11 }
 0x205   :  { %1603 = vtanh.bf16 %v584_v12  ;;  %v558_v16 = vadd.f32 %v1403_v14, %v2045_v24 }
 0x206   :  { %v1405_v15 = vpop.f32.mrf.mxu1 }
 0x207   :  { %v1406_v40 = vadd.f32 %v1405_v15, %v1404_v13 }
 0x208   :  { %v1407_v42 = vpop.f32.mrf.mxu1 }
 0x209   :  { %v561_v17 = vadd.f32 %v1406_v40, %v2045_v24 }
 0x20a   :  { %v1408_v18 = vpop.f32.mrf.mxu1 }
 0x20b   :  { %v1602_v19 = vpop.eup %1601  ;;  %v585_v20 = vpack.c.bf16 %v561_v17, %v558_v16  ;;  %v1409_v22 = vadd.f32 %v1408_v18, %v1407_v42 }
 0x20c   :  { %v1410_v21 = vpop.f32.mrf.mxu1  ;;  %1465 = vmatmul.mubr.bf16.gmra.mxu0 %v1602_v19 }
 0x20d   :  { %1605 = vtanh.bf16 %v585_v20  ;;  %v566_v27 = vadd.f32 %v1409_v22, %v2045_v24 }
 0x20e   :  { %v1411_v23 = vpop.f32.mrf.mxu1 }
 0x20f   :  { %v1412_v25 = vadd.f32 %v1411_v23, %v1410_v21 }
 0x210   :  { %v1413_v26 = vpop.f32.mrf.mxu1 }
 0x211   :  { %v569_v28 = vadd.f32 %v1412_v25, %v2045_v24 }
 0x212   :  { %v1414_v29 = vpop.f32.mrf.mxu1 }
 0x213   :  { %v1604_v30 = vpop.eup %1603  ;;  %v586_v31 = vpack.c.bf16 %v569_v28, %v566_v27  ;;  %v1415_v33 = vadd.f32 %v1414_v29, %v1413_v26 }
 0x214   :  { %v1416_v32 = vpop.f32.mrf.mxu1  ;;  %1468 = vmatprep.mubr.bf16.mxu0 %v1604_v30 }
 0x215   :  { %1607 = vtanh.bf16 %v586_v31  ;;  %v574_v39 = vadd.f32 %v1415_v33, %v2045_v24 }
 0x216   :  { %v1417_v34 = vpop.f32.mrf.mxu1 }
 0x217   :  { %v1418_v37 = vadd.f32 %v1417_v34, %v1416_v32 }
 0x219   :  { %v577_v41 = vadd.f32 %v1418_v37, %v2045_v24  ;;  %v1547_v37 = vld [vmem:[#allocation9 + $0x54] ss:$8 sps:$4 sm:$0xff]  }
 0x21a   :  { %1042 = vmatprep.subr.bf16.mxu0 %v1547_v37 }
 0x21b   :  { %v1606_v43 = vpop.eup %1605  ;;  %v587_v44 = vpack.c.bf16 %v577_v41, %v574_v39  ;;  %v1545_v39 = vld [vmem:[#allocation9 + $0x50] ss:$8 sps:$4 sm:$0xff]   ;;  %v1550_v41 = vld [vmem:[#allocation9 + $0x44] ss:$8 sps:$4 sm:$0xff]  }
 0x21c   :  { %1469 = vmatmul.mubr.bf16.gmra.mxu0 %v1606_v43  ;;  %v1548_v43 = vld [vmem:[#allocation9 + $0x40] ss:$8 sps:$4 sm:$0xff]  }
 0x21d   :  { %1609 = vtanh.bf16 %v587_v44  ;;  %1043 = vmatpush1.bf16.msra.mxu0 %v1545_v39  ;;  %v1553_v44 = vld [vmem:[#allocation9 + $0x34] ss:$8 sps:$4 sm:$0xff]   ;;  %v946_v39 = vld [vmem:[%s2217_s10] sm:$0x3] }
 0x21e   :  { %1044 = vmatprep.subr.bf16.mxu0 %v1550_v41 }
 0x221   :  { %1045 = vmatpush1.bf16.msra.mxu0 %v1548_v43  ;;  %v2086_v43 = vrot.slane %v946_v39, %v1988_v36 }
 0x222   :  { %1046 = vmatprep.subr.bf16.mxu0 %v1553_v44 }
 0x223   :  { %v1608_v45 = vpop.eup %1607 }
 0x224   :  { %1472 = vmatprep.mubr.bf16.mxu0 %v1608_v45  ;;  %v1551_v45 = vld [vmem:[#allocation9 + $0x30] ss:$8 sps:$4 sm:$0xff]  }
 0x225   :  { %1047 = vmatpush1.bf16.msra.mxu0 %v1551_v45  ;;  %v2090_v45 = vrot.slane %v946_v39, %v122_v38 }
 0x226   :  { %1048 = vmatprep.subr.bf16.mxu0 %v1556_v47 }
 0x22b   :  { %v1610_v46 = vpop.eup %1609 }
 0x22c   :  { %1473 = vmatmul.mubr.bf16.gmra.mxu0 %v1610_v46  ;;  %v1554_v46 = vld [vmem:[#allocation9 + $0x20] ss:$8 sps:$4 sm:$0xff]  }
 0x22d   :  { %1070 = vmatprep.mubr.bf16.mxu0 %v1793_v1  ;;  %1049 = vmatpush1.bf16.msra.mxu0 %v1554_v46 }
 0x22e   :  { %1050 = vmatprep.subr.bf16.mxu0 %v1559_v48 }
 0x231   :  { %1051 = vmatpush1.bf16.msra.mxu0 %v1557_v49 }
 0x232   :  { %1052 = vmatprep.subr.bf16.mxu0 %v1562_v50 }
 0x2bc   :  { %v1462_v51 = vpop.f32.mrf.mxu0 }
 0x2bd   :  { %v710_v55 = vadd.f32 %v1462_v51, %v1319_v52  ;;  %v1560_v51 = vld [vmem:[#allocation9] ss:$8 sps:$4 sm:$0xff]  }
 0x2be   :  { %v701_v24 = vpop.f32.mrf.mxu0  ;;  %1053 = vmatpush1.bf16.msra.mxu0 %v1560_v51 }
 0x2bf   :  { %v702_v57 = vadd.f32 %v1319_v52, %v701_v24 }
 0x2c0   :  { %v1463_v53 = vpop.f32.mrf.mxu0 }
 0x2c1   :  { %v713_v54 = vadd.f32 %v1463_v53, %v1319_v52 }
 0x2c2   :  { %v704_v56 = vpop.f32.mrf.mxu0 }
 0x2c3   :  { %v705_v58 = vadd.f32 %v1319_v52, %v704_v56  ;;  %v765_v59 = vpack.c.bf16 %v713_v54, %v710_v55  ;;  %v1328_v54 = vld [vmem:[%s2215_s8] ss:$0 sm:$0xff] }
 0x2c5   :  { %v764_v60 = vpack.c.bf16 %v705_v58, %v702_v57 }
 0x2c7   :  { %1611 = vtanh.bf16 %v764_v60 }
 0x2c8   :  { %1613 = vtanh.bf16 %v765_v59 }
 0x2cc   :  { %v1466_v61 = vpop.f32.mrf.mxu0 }
 0x2cd   :  { %v726_v2 = vadd.f32 %v1466_v61, %v1319_v52 }
 0x2ce   :  { %v717_v62 = vpop.f32.mrf.mxu0 }
 0x2cf   :  { %v718_v4 = vadd.f32 %v1319_v52, %v717_v62 }
 0x2d0   :  { %v1467_v63 = vpop.f32.mrf.mxu0 }
 0x2d1   :  { %v729_v0 = vadd.f32 %v1467_v63, %v1319_v52 }
 0x2d2   :  { %v720_v3 = vpop.f32.mrf.mxu0 }
 0x2d3   :  { %v721_v5 = vadd.f32 %v1319_v52, %v720_v3  ;;  %v767_v6 = vpack.c.bf16 %v729_v0, %v726_v2 }
 0x2d5   :  { %v1612_v7 = vpop.eup %1611  ;;  %v766_v8 = vpack.c.bf16 %v721_v5, %v718_v4 }
 0x2d6   :  { %v1614_v9 = vpop.eup %1613  ;;  %1478 = vmatprep.mubr.msk.bf16.mxu1 %vm788_vm3, %v1612_v7 }
 0x2d7   :  { %1615 = vtanh.bf16 %v766_v8  ;;  %1479 = vmatmul.mubr.msk.bf16.vlgmr.msra.gmra.mxu1 %vm788_vm3, %v1614_v9 }
 0x2d8   :  { %1617 = vtanh.bf16 %v767_v6 }
 0x2dc   :  { %v1470_v10 = vpop.f32.mrf.mxu0 }
 0x2dd   :  { %v742_v14 = vadd.f32 %v1470_v10, %v1319_v52 }
 0x2de   :  { %v733_v11 = vpop.f32.mrf.mxu0 }
 0x2df   :  { %v734_v40 = vadd.f32 %v1319_v52, %v733_v11 }
 0x2e0   :  { %v1471_v12 = vpop.f32.mrf.mxu0 }
 0x2e1   :  { %v745_v13 = vadd.f32 %v1471_v12, %v1319_v52 }
 0x2e2   :  { %v736_v15 = vpop.f32.mrf.mxu0 }
 0x2e3   :  { %v737_v42 = vadd.f32 %v1319_v52, %v736_v15  ;;  %v769_v16 = vpack.c.bf16 %v745_v13, %v742_v14 }
 0x2e5   :  { %v1616_v17 = vpop.eup %1615  ;;  %v768_v18 = vpack.c.bf16 %v737_v42, %v734_v40 }
 0x2e6   :  { %v1618_v19 = vpop.eup %1617  ;;  %1482 = vmatprep.mubr.msk.bf16.mxu1 %vm788_vm3, %v1616_v17 }
 0x2e7   :  { %1619 = vtanh.bf16 %v768_v18  ;;  %1483 = vmatmul.mubr.msk.bf16.gmra.mxu1 %vm788_vm3, %v1618_v19 }
 0x2e8   :  { %1621 = vtanh.bf16 %v769_v16 }
 0x2ec   :  { %v1474_v20 = vpop.f32.mrf.mxu0 }
 0x2ed   :  { %v758_v25 = vadd.f32 %v1474_v20, %v1319_v52 }
 0x2ee   :  { %v749_v21 = vpop.f32.mrf.mxu0 }
 0x2ef   :  { %v750_v27 = vadd.f32 %v1319_v52, %v749_v21 }
 0x2f0   :  { %v1475_v22 = vpop.f32.mrf.mxu0 }
 0x2f1   :  { %v761_v23 = vadd.f32 %v1475_v22, %v1319_v52 }
 0x2f2   :  { %v752_v26 = vpop.f32.mrf.mxu0 }
 0x2f3   :  { %v753_v28 = vadd.f32 %v1319_v52, %v752_v26  ;;  %v771_v29 = vpack.c.bf16 %v761_v23, %v758_v25 }
 0x2f5   :  { %v1620_v30 = vpop.eup %1619  ;;  %v770_v31 = vpack.c.bf16 %v753_v28, %v750_v27 }
 0x2f6   :  { %v1622_v32 = vpop.eup %1621  ;;  %1486 = vmatprep.mubr.msk.bf16.mxu1 %vm788_vm3, %v1620_v30 }
 0x2f7   :  { %1623 = vtanh.bf16 %v770_v31  ;;  %1487 = vmatmul.mubr.msk.bf16.gmra.mxu1 %vm788_vm3, %v1622_v32 }
 0x2f8   :  { %1625 = vtanh.bf16 %v771_v29 }
 0x305   :  { %v1624_v33 = vpop.eup %1623 }
 0x306   :  { %v1626_v34 = vpop.eup %1625  ;;  %1490 = vmatprep.mubr.msk.bf16.mxu1 %vm788_vm3, %v1624_v33 }
 0x307   :  { %1491 = vmatmul.mubr.msk.bf16.gmra.mxu1 %vm788_vm3, %v1626_v34 }
 0x397   :  { %v1480_v24 = vpop.f32.mrf.mxu1 }
 0x398   :  { %v860_v60 = vadd.f32 %v1480_v24, %v1328_v54 }
 0x399   :  { %v851_v52 = vpop.f32.mrf.mxu1 }
 0x39a   :  { %v852_v56 = vadd.f32 %v1328_v54, %v851_v52  ;;  %v1794_v52 = vmov 1966171168  }
 0x39b   :  { %v1481_v53 = vpop.f32.mrf.mxu1 }
 0x39c   :  { %v863_v59 = vadd.f32 %v1481_v53, %v1328_v54  ;;  %v1204_v53 = vunpack.c.l.s4 %v1794_v52 }
 0x39d   :  { %v854_v55 = vpop.f32.mrf.mxu1 }
 0x39e   :  { %v855_v57 = vadd.f32 %v1328_v54, %v854_v55  ;;  %v915_v61 = vpack.c.bf16 %v863_v59, %v860_v60  ;;  %v2111_v55 = vld.sshfl [vmem:[%s2218_s11] sm:$0x11 pattern:$0x75316420]  ;;  %s1795_s11 = smov [#allocation11]  }
 0x39f   :  { %s1272_s29 = sshll.u32 %s1795_s11, 4  ;;  %s1273_s29 = int_to_ptr.vmem [resolvable:$true] %s1272_s29 }
 0x3a0   :  { %v914_v58 = vpack.c.bf16 %v855_v57, %v852_v56  ;;  %v1205_v56 = vunpack.c.0.s8 %v1204_v53  ;;  %s1759_s30 = scalar_lea.vmem %s1273_s29, 16  ;;  %s1763_s6 = scalar_lea.vmem %s1273_s29, 32 }
 0x3a1   :  { %p1760_p6 = scmp.ne.s32.totalorder %s1273_s29, %s1759_s30  ;;  %p1764_p7 = scmp.lt.s32.totalorder %s1273_s29, %s1273_s29 }
 0x3a2   :  { %1627 = vtanh.bf16 %v914_v58  ;;  %v1202_v58 = vcombine.high %v2111_v55, %v2111_v55  ;;  %p1765_p8 = scmp.lt.s32.totalorder %s1763_s6, %s1759_s30 }
 0x3a3   :  { %1629 = vtanh.bf16 %v915_v61  ;;  %v2122_v61 = vsub.s32 %v1205_v56, %v1985_v35 }
 0x3a4   :  { %p1766_p9 = por %p1765_p8, %p1764_p7 }
 0x3a6   :  { %p1767_p10 = pnand %p1766_p9, %p1760_p6 }
 0x3a7   :  { %v1484_v62 = vpop.f32.mrf.mxu1 }
 0x3a8   :  { %v876_v8 = vadd.f32 %v1484_v62, %v1328_v54 }
 0x3a9   :  { %v867_v63 = vpop.f32.mrf.mxu1 }
 0x3aa   :  { %v868_v3 = vadd.f32 %v1328_v54, %v867_v63 }
 0x3ab   :  { %v1485_v0 = vpop.f32.mrf.mxu1 }
 0x3ac   :  { %v879_v7 = vadd.f32 %v1485_v0, %v1328_v54 }
 0x3ad   :  { %v870_v2 = vpop.f32.mrf.mxu1 }
 0x3ae   :  { %v871_v4 = vadd.f32 %v1328_v54, %v870_v2  ;;  %v917_v9 = vpack.c.bf16 %v879_v7, %v876_v8  ;;  %v1184_v7 = vld [vmem:[#allocation2] sm:$0x1] }
 0x3af   :  { %1187 = vperm.xlu0 %1504, %v1184_v7  }
 0x3b0   :  { %v1628_v5 = vpop.eup %1627  ;;  %v916_v6 = vpack.c.bf16 %v871_v4, %v868_v3  ;;  %v1209_v3 = vrot.slane %v2111_v55, %v2122_v61  ;;  %v1216_v4 = vrot.slane %v1202_v58, %v2122_v61 }
 0x3b1   :  { %1071 = vmatmul.mubr.bf16.vlgmr.msra.gmra.mxu0 %v1628_v5  ;;  %v1630_v11 = vpop.eup %1629 }
 0x3b2   :  { %1631 = vtanh.bf16 %v916_v6  ;;  %1080 = vmatprep.mubr.bf16.mxu0 %v1793_v1  ;;  %1251 = vmatprep.mubr.bf16.mxu1 %v1216_v4 }
 0x3b3   :  { %1633 = vtanh.bf16 %v917_v9 }
 0x3b7   :  { %v1488_v10 = vpop.f32.mrf.mxu1 }
 0x3b8   :  { %v892_v18 = vadd.f32 %v1488_v10, %v1328_v54 }
 0x3b9   :  { %v883_v12 = vpop.f32.mrf.mxu1  ;;  %1081 = vmatmul.mubr.bf16.gmra.mxu0 %v1630_v11 }
 0x3ba   :  { %1090 = vmatprep.mubr.bf16.mxu0 %v1793_v1  ;;  %v884_v15 = vadd.f32 %v1328_v54, %v883_v12 }
 0x3bb   :  { %v1489_v13 = vpop.f32.mrf.mxu1 }
 0x3bc   :  { %v895_v17 = vadd.f32 %v1489_v13, %v1328_v54 }
 0x3bd   :  { %v886_v14 = vpop.f32.mrf.mxu1 }
 0x3be   :  { %v887_v40 = vadd.f32 %v1328_v54, %v886_v14  ;;  %v919_v19 = vpack.c.bf16 %v895_v17, %v892_v18 }
 0x3c0   :  { %v1632_v42 = vpop.eup %1631  ;;  %v918_v16 = vpack.c.bf16 %v887_v40, %v884_v15 }
 0x3c1   :  { %1091 = vmatmul.mubr.bf16.gmra.mxu0 %v1632_v42  ;;  %v1634_v21 = vpop.eup %1633 }
 0x3c2   :  { %1635 = vtanh.bf16 %v918_v16  ;;  %1100 = vmatprep.mubr.bf16.mxu0 %v1793_v1 }
 0x3c3   :  { %1637 = vtanh.bf16 %v919_v19 }
 0x3c7   :  { %v1492_v20 = vpop.f32.mrf.mxu1 }
 0x3c8   :  { %v908_v31 = vadd.f32 %v1492_v20, %v1328_v54 }
 0x3c9   :  { %v899_v22 = vpop.f32.mrf.mxu1  ;;  %1101 = vmatmul.mubr.bf16.gmra.mxu0 %v1634_v21 }
 0x3ca   :  { %1110 = vmatprep.mubr.bf16.mxu0 %v1793_v1  ;;  %v900_v26 = vadd.f32 %v1328_v54, %v899_v22 }
 0x3cb   :  { %v1493_v23 = vpop.f32.mrf.mxu1 }
 0x3cc   :  { %v911_v30 = vadd.f32 %v1493_v23, %v1328_v54 }
 0x3cd   :  { %v902_v25 = vpop.f32.mrf.mxu1 }
 0x3ce   :  { %v903_v27 = vadd.f32 %v1328_v54, %v902_v25  ;;  %v921_v32 = vpack.c.bf16 %v911_v30, %v908_v31 }
 0x3d0   :  { %v1636_v28 = vpop.eup %1635  ;;  %v920_v29 = vpack.c.bf16 %v903_v27, %v900_v26 }
 0x3d1   :  { %1111 = vmatmul.mubr.bf16.gmra.mxu0 %v1636_v28  ;;  %v1638_v33 = vpop.eup %1637 }
 0x3d2   :  { %1639 = vtanh.bf16 %v920_v29  ;;  %1120 = vmatprep.mubr.bf16.mxu0 %v1793_v1 }
 0x3d3   :  { %1641 = vtanh.bf16 %v921_v32 }
 0x3d9   :  { %1121 = vmatmul.mubr.bf16.gmra.mxu0 %v1638_v33 }
 0x3da   :  { %1130 = vmatprep.mubr.bf16.mxu0 %v1793_v1 }
 0x3e0   :  { %v1640_v34 = vpop.eup %1639 }
 0x3e1   :  { %1131 = vmatmul.mubr.bf16.gmra.mxu0 %v1640_v34  ;;  %v1642_v37 = vpop.eup %1641 }
 0x3e2   :  { %1140 = vmatprep.mubr.bf16.mxu0 %v1793_v1 }
 0x3e9   :  { %1141 = vmatmul.mubr.bf16.gmra.mxu0 %v1642_v37 }
 0x471   :  { %v1072_v41 = vpop.f32.mrf.mxu0 }
 0x472   :  { %v2093_v47 = vadd.f32 %v1072_v41, %v2086_v43 }
 0x473   :  { %v1074_v44 = vpop.f32.mrf.mxu0 }
 0x474   :  { %v2099_v49 = vadd.f32 %v1074_v44, %v2090_v45 }
 0x475   :  { %v1076_v46 = vpop.f32.mrf.mxu0 }
 0x476   :  { %v2096_v1 = vadd.f32 %v1076_v46, %v2086_v43 }
 0x477   :  { %v1078_v48 = vpop.f32.mrf.mxu0 }
 0x478   :  { %v1151_v50 = vpack.c.bf16 %v2096_v1, %v2093_v47  ;;  %v2104_v51 = vadd.f32 %v1078_v48, %v2090_v45 }
 0x479   :  { %v1082_v24 = vpop.f32.mrf.mxu0 }
 0x47a   :  { %v1152_v38 = vpack.c.bf16 %v2104_v51, %v2099_v49  ;;  %v2116_v59 = vadd.f32 %v1082_v24, %v2086_v43  ;;  %v1188_v49 = vpop.permute.xlu0 %1187 }
 0x47b   :  { %v1084_v54 = vpop.f32.mrf.mxu0  ;;  %v1193_v51 = vrot.slane %v1188_v49, %v1988_v36 }
 0x47c   :  { %v2125_v62 = vadd.f32 %v1084_v54, %v2090_v45 }
 0x47d   :  { %v1086_v57 = vpop.f32.mrf.mxu0 }
 0x47e   :  { %v2119_v60 = vadd.f32 %v1086_v57, %v2086_v43 }
 0x47f   :  { %v1088_v63 = vpop.f32.mrf.mxu0 }
 0x480   :  { %v1153_v0 = vpack.c.bf16 %v2119_v60, %v2116_v59  ;;  %v2130_v2 = vadd.f32 %v1088_v63, %v2090_v45 }
 0x481   :  { %v1092_v5 = vpop.f32.mrf.mxu0 }
 0x482   :  { %v1154_v35 = vpack.c.bf16 %v2130_v2, %v2125_v62  ;;  %v2138_v9 = vadd.f32 %v1092_v5, %v2086_v43 }
 0x483   :  { %v1094_v6 = vpop.f32.mrf.mxu0 }
 0x484   :  { %v2144_v12 = vadd.f32 %v1094_v6, %v2090_v45 }
 0x485   :  { %v1096_v8 = vpop.f32.mrf.mxu0 }
 0x486   :  { %v2141_v10 = vadd.f32 %v1096_v8, %v2086_v43 }
 0x487   :  { %v1098_v11 = vpop.f32.mrf.mxu0 }
 0x488   :  { %v1155_v13 = vpack.c.bf16 %v2141_v10, %v2138_v9  ;;  %v2149_v14 = vadd.f32 %v1098_v11, %v2090_v45 }
 0x489   :  { %v1102_v15 = vpop.f32.mrf.mxu0 }
 0x48a   :  { %v1156_v40 = vpack.c.bf16 %v2149_v14, %v2144_v12  ;;  %v2154_v17 = vadd.f32 %v1102_v15, %v2086_v43 }
 0x48b   :  { %v1104_v42 = vpop.f32.mrf.mxu0 }
 0x48d   :  { %v1106_v16 = vpop.f32.mrf.mxu0 }
 0x48e   :  { %v2157_v18 = vadd.f32 %v1106_v16, %v2086_v43 }
 0x48f   :  { %v1108_v19 = vpop.f32.mrf.mxu0 }
 0x490   :  { %v1157_v20 = vpack.c.bf16 %v2157_v18, %v2154_v17 }
 0x491   :  { %v1112_v21 = vpop.f32.mrf.mxu0 }
 0x493   :  { %v1114_v22 = vpop.f32.mrf.mxu0 }
 0x494   :  { %v1115_v16 = vadd.f32 %v1114_v22, %v2090_v45 }
 0x495   :  { %v1116_v23 = vpop.f32.mrf.mxu0 }
 0x497   :  { %v1118_v25 = vpop.f32.mrf.mxu0 }
 0x498   :  { %v1119_v11 = vadd.f32 %v1118_v25, %v2090_v45  ;;  %v1113_v25 = vadd.f32 %v1112_v21, %v2086_v43 }
 0x499   :  { %v1122_v26 = vpop.f32.mrf.mxu0 }
 0x49a   :  { %v1123_v15 = vadd.f32 %v1122_v26, %v2086_v43  ;;  %v1105_v26 = vadd.f32 %v1104_v42, %v2090_v45 }
 0x49b   :  { %v1124_v27 = vpop.f32.mrf.mxu0 }
 0x49c   :  { %v1125_v5 = vadd.f32 %v1124_v27, %v2090_v45  ;;  %v1117_v27 = vadd.f32 %v1116_v23, %v2086_v43 }
 0x49d   :  { %v1126_v28 = vpop.f32.mrf.mxu0 }
 0x49e   :  { %v1127_v8 = vadd.f32 %v1126_v28, %v2086_v43  ;;  %v1109_v28 = vadd.f32 %v1108_v19, %v2090_v45 }
 0x49f   :  { %v1128_v29 = vpop.f32.mrf.mxu0 }
 0x4a0   :  { %v1129_v63 = vadd.f32 %v1128_v29, %v2090_v45  ;;  %v1160_v29 = vpack.c.bf16 %v1119_v11, %v1115_v16  ;;  %v1158_v22 = vpack.c.bf16 %v1109_v28, %v1105_v26 }
 0x4a1   :  { %v1132_v30 = vpop.f32.mrf.mxu0 }
 0x4a2   :  { %v1133_v4 = vadd.f32 %v1132_v30, %v2086_v43  ;;  %v1162_v7 = vpack.c.bf16 %v1129_v63, %v1125_v5 }
 0x4a3   :  { %v1134_v31 = vpop.f32.mrf.mxu0 }
 0x4a4   :  { %v1135_v24 = vadd.f32 %v1134_v31, %v2090_v45  ;;  %v1161_v31 = vpack.c.bf16 %v1127_v8, %v1123_v15 }
 0x4a5   :  { %v1136_v32 = vpop.f32.mrf.mxu0 }
 0x4a6   :  { %v1137_v58 = vadd.f32 %v1136_v32, %v2086_v43 }
 0x4a7   :  { %v1138_v33 = vpop.f32.mrf.mxu0 }
 0x4a8   :  { %v1139_v41 = vadd.f32 %v1138_v33, %v2090_v45  ;;  %v1163_v6 = vpack.c.bf16 %v1137_v58, %v1133_v4 }
 0x4a9   :  { %v1142_v34 = vpop.f32.mrf.mxu0 }
 0x4aa   :  { %v1143_v46 = vadd.f32 %v1142_v34, %v2086_v43  ;;  %v1164_v56 = vpack.c.bf16 %v1139_v41, %v1135_v24  ;;  %v1159_v34 = vpack.c.bf16 %v1117_v27, %v1113_v25 }
 0x4ab   :  { %v1144_v37 = vpop.f32.mrf.mxu0 }
 0x4ac   :  { %v1145_v52 = vadd.f32 %v1144_v37, %v2090_v45 }
 0x4ad   :  { %v1146_v39 = vpop.f32.mrf.mxu0 }
 0x4ae   :  { %v1147_v44 = vadd.f32 %v1146_v39, %v2086_v43 }
 0x4af   :  { %v1148_v48 = vpop.f32.mrf.mxu0 }
 0x4b0   :  { %v1149_v53 = vadd.f32 %v1148_v48, %v2090_v45  ;;  %v1165_v54 = vpack.c.bf16 %v1147_v44, %v1143_v46 }
 0x4b2   :  { %v1166_v57 = vpack.c.bf16 %v1149_v53, %v1145_v52 }
 0x4b4   :  { %1643 = vtanh.bf16 %v1166_v57 }
 0x4b5   :  { %1645 = vtanh.bf16 %v1165_v54 }
 0x4b6   :  { %1647 = vtanh.bf16 %v1164_v56 }
 0x4b7   :  { %1649 = vtanh.bf16 %v1163_v6 }
 0x4b8   :  { %1651 = vtanh.bf16 %v1162_v7 }
 0x4b9   :  { %1653 = vtanh.bf16 %v1161_v31 }
 0x4ba   :  { %1655 = vtanh.bf16 %v1160_v29 }
 0x4bb   :  { %1657 = vtanh.bf16 %v1159_v34 }
 0x4bc   :  { %1659 = vtanh.bf16 %v1158_v22 }
 0x4bd   :  { %1661 = vtanh.bf16 %v1157_v20 }
 0x4be   :  { %1663 = vtanh.bf16 %v1156_v40 }
 0x4bf   :  { %1665 = vtanh.bf16 %v1155_v13 }
 0x4c0   :  { %1667 = vtanh.bf16 %v1154_v35 }
 0x4c1   :  { %1669 = vtanh.bf16 %v1153_v0 }
 0x4c2   :  { %v1644_v32 = vpop.eup %1643  ;;  %1671 = vtanh.bf16 %v1152_v38 }
 0x4c3   :  { %v1646_v33 = vpop.eup %1645  ;;  %1219 = vmatprep.subr.bf16.mxu1 %v1644_v32  ;;  %1673 = vtanh.bf16 %v1151_v50 }
 0x4c4   :  { %v1648_v30 = vpop.eup %1647  ;;  %1220 = vmatpush1.bf16.xpose.msra.mxu1 %v1646_v33 }
 0x4c5   :  { %1221 = vmatprep.subr.bf16.mxu1 %v1648_v30  ;;  %v1650_v37 = vpop.eup %1649 }
 0x4c6   :  { %v1652_v39 = vpop.eup %1651 }
 0x4c7   :  { %v1654_v41 = vpop.eup %1653 }
 0x4c8   :  { %v1656_v44 = vpop.eup %1655 }
 0x4c9   :  { %v1658_v43 = vpop.eup %1657 }
 0x4ca   :  { %v1660_v45 = vpop.eup %1659 }
 0x4cb   :  { %v1662_v42 = vpop.eup %1661 }
 0x4cc   :  { %1222 = vmatpush1.bf16.xpose.msra.mxu1 %v1650_v37  ;;  %v1664_v17 = vpop.eup %1663 }
 0x4cd   :  { %1223 = vmatprep.subr.bf16.mxu1 %v1652_v39  ;;  %v1666_v12 = vpop.eup %1665 }
 0x4ce   :  { %v1668_v9 = vpop.eup %1667 }
 0x4cf   :  { %v1670_v62 = vpop.eup %1669 }
 0x4d0   :  { %v1672_v2 = vpop.eup %1671 }
 0x4d1   :  { %v1674_v35 = vpop.eup %1673 }
 0x4d4   :  { %1224 = vmatpush1.bf16.xpose.msra.mxu1 %v1654_v41 }
 0x4d5   :  { %1225 = vmatprep.subr.bf16.mxu1 %v1656_v44 }
 0x4dc   :  { %1226 = vmatpush1.bf16.xpose.msra.mxu1 %v1658_v43 }
 0x4dd   :  { %1227 = vmatprep.subr.bf16.mxu1 %v1660_v45 }
 0x4e4   :  { %1228 = vmatpush1.bf16.xpose.msra.mxu1 %v1662_v42 }
 0x4e5   :  { %1229 = vmatprep.subr.bf16.mxu1 %v1664_v17 }
 0x4ec   :  { %1230 = vmatpush1.bf16.xpose.msra.mxu1 %v1666_v12 }
 0x4ed   :  { %1231 = vmatprep.subr.bf16.mxu1 %v1668_v9 }
 0x4f4   :  { %1232 = vmatpush1.bf16.xpose.msra.mxu1 %v1670_v62 }
 0x4f5   :  { %1233 = vmatprep.subr.bf16.mxu1 %v1672_v2 }
 0x4fc   :  { %1234 = vmatpush1.bf16.xpose.msra.mxu1 %v1674_v35 }
 0x503   :  { %1252 = vmatmul.mubr.bf16.vlgmr.msra.gmra.mxu1 %v1209_v3 }
 0x5c3   :  { %v1253_v38 = vpop.f32.mrf.mxu1 }
 0x5c4   :  { %v1254_v59 = vadd.f32 %v1253_v38, %v1193_v51 }
 0x5c5   :  { %v1255_v60 = vpop.f32.mrf.mxu1 }
 0x5c6   :  { %v1354_v0 = vmul.f32 -1.442695, %v1254_v59 }
 0x5c7   :  { %v1256_v47 = vpop.f32.mrf.mxu1 }
 0x5c8   :  { %1675 = vpow2.f32 %v1354_v0 }
 0x5c9   :  { %v1257_v1 = vpop.f32.mrf.mxu1 }
 0x5d5   :  { %v1676_v50 = vpop.eup %1675 }
 0x5d6   :  { %v1262_v10 = vadd.f32 1.0, %v1676_v50 }
 0x5d8   :  { %1677 = vrcp.f32 %v1262_v10 }
 0x5e5   :  { %v1678_v13 = vpop.eup %1677 }
 0x5e6   :  { %1265 = vst [vmem:[#allocation11] sm:$0x1] %v1678_v13 }
 0x5e7   :  { %1770 = shalt.err (!%p1767_p10)
}
 0x5e8   :  { %1275 = dma.vmem_to_hbm [thread:$0]  %s1273_s29, 16, %s2220_s13, [#allocation5]  }
 0x5e9   :  { %1785 = dma.done.wait [#allocation5], 16  }
 0x5ea   :  { %1786 = vsyncadd [#allocation5], 4294967280 }
 0x5eb   :  { %1279 = vsyncpa [#allocation4], 1 }
 0x5ec   :  { %1280 = vsyncpa [#allocation7], 1 }
 0x5ed   :  { %1281 = vsyncpa [#allocation10], 1 }
 0x5ee   :  { %1282 = vsyncpa [#allocation5], 1 }

</bundles_post_ra>
